<compile_context>
chip_gen: v6e
topology: v6e:2x2x1
jax: 0.10.0
libtpu: 0.0.40
codegen_flags: <defaults>
</compile_context>

<pallas_src>
import functools

import jax
import jax.numpy as jnp
from jax.experimental import pallas as pl
from jax.experimental.pallas import tpu as pltpu

D_IN = 256       # flattened input features
D_HID = 128      # fc1 output
D_OUT = 10       # fc2 output (logical)
D_OUT_PAD = 128  # fc2 weight padded to a full lane width for the MXU


def mlp_kernel(x_ref, w1_ref, b1_ref, w2_ref, b2_ref, o_ref):
    # Cast x to the weight dtype in-kernel (no-op for f32 weights; free VPU
    # work for the bf16 path — no separate XLA cast pass over x in HBM).
    x = x_ref[...].astype(w1_ref.dtype)
    # fc1 (MXU, f32 accumulation) + bias + ReLU in f32.
    h = jnp.dot(x, w1_ref[...], preferred_element_type=jnp.float32)
    h = jnp.maximum(h + b1_ref[...], 0.0)
    # fc2 on the 128-lane padded weight; accumulate in f32.
    out = jnp.dot(h.astype(w2_ref.dtype), w2_ref[...],
                  preferred_element_type=jnp.float32)
    out = out + b2_ref[...]
    # Store only the 10 real logits (narrow, masked store is hidden under DMA).
    o_ref[...] = out[:, :D_OUT].astype(o_ref.dtype)


def _round_up(x, m):
    return ((x + m - 1) // m) * m


@functools.partial(jax.jit, static_argnames=("compute_dtype", "block_b"))
def mlp_forward(x_nchw, w1, b1, w2, b2, *, compute_dtype=jnp.bfloat16,
                block_b=None):
    """Forward pass equivalent to MyMLP: relu(x @ w1 + b1) @ w2 + b2.

    x_nchw : (B, ...) with prod(...) == 256 (flattened row-major, same
             semantics as torch's x.view(x.size(0), -1)).
    w1 : (256, 128), b1 : (1, 128), w2 : (128, 10), b2 : (1, 10).
    Returns (B, 10) float32 logits.
    """
    B = x_nchw.shape[0]
    x2d = x_nchw.reshape(B, -1)
    assert x2d.shape[1] == D_IN, "flattened feature dim must be 256"

    # --- batch tile: multiple of 8 (sublane), capped at 2048 (well inside
    # every generation's scoped VMEM with double-buffered x/out).
    if block_b is None:
        block_b = min(2048, _round_up(B, 8))
        # v7x megacore: keep at least 2 grid steps so both TensorCores work.
        if B >= 16 and pl.cdiv(B, block_b) < 2:
            block_b = _round_up(pl.cdiv(B, 2), 8)
    block_b = max(8, _round_up(int(block_b), 8))
    grid = (pl.cdiv(B, block_b),)   # ragged last block handled by Pallas.

    # --- fc2 weight/bias padded to 128 output lanes (tiny, grid-resident).
    w2p = jnp.zeros((D_HID, D_OUT_PAD), w2.dtype).at[:, :D_OUT].set(w2)
    b2p = jnp.zeros((1, D_OUT_PAD), jnp.float32).at[:, :D_OUT].set(
        b2.astype(jnp.float32))

    # --- weights in compute dtype (bf16 default); biases stay f32 so the
    # bias-add/ReLU stay full precision.  x is NOT touched here.
    w1_c = w1.astype(compute_dtype)
    w2_c = w2p.astype(compute_dtype)
    b1_f = b1.astype(jnp.float32)

    out = pl.pallas_call(
        mlp_kernel,
        out_shape=jax.ShapeDtypeStruct((B, D_OUT), jnp.float32),
        grid=grid,
        in_specs=[
            pl.BlockSpec((block_b, D_IN), lambda i: (i, 0)),       # x tile
            pl.BlockSpec((D_IN, D_HID), lambda i: (0, 0)),         # w1 resident
            pl.BlockSpec((1, D_HID), lambda i: (0, 0)),            # b1 resident
            pl.BlockSpec((D_HID, D_OUT_PAD), lambda i: (0, 0)),    # w2 resident
            pl.BlockSpec((1, D_OUT_PAD), lambda i: (0, 0)),        # b2 resident
        ],
        out_specs=pl.BlockSpec((block_b, D_OUT), lambda i: (i, 0)),
        compiler_params=pltpu.CompilerParams(
            dimension_semantics=("parallel",),
            vmem_limit_bytes=32 * 1024 * 1024),
    )(x2d, w1_c, b1_f, w2_c, b2p)
    return out


def init_params(key):
    # nn.Linear default init: U(-1/sqrt(fan_in), +1/sqrt(fan_in)).
    k1, k2, k3, k4 = jax.random.split(key, 4)
    lim1 = 1.0 / jnp.sqrt(256.0)
    lim2 = 1.0 / jnp.sqrt(128.0)
    w1 = jax.random.uniform(k1, (D_IN, D_HID), jnp.float32, -lim1, lim1)
    b1 = jax.random.uniform(k2, (1, D_HID), jnp.float32, -lim1, lim1)
    w2 = jax.random.uniform(k3, (D_HID, D_OUT), jnp.float32, -lim2, lim2)
    b2 = jax.random.uniform(k4, (1, D_OUT), jnp.float32, -lim2, lim2)
    return w1, b1, w2, b2


if __name__ == "__main__":
    key = jax.random.PRNGKey(0)
    kx, kp = jax.random.split(key)
    # Small NCHW input whose flattened features == 256 (4 * 8 * 8).
    x = jax.random.normal(kx, (8, 4, 8, 8), jnp.float32)
    w1, b1, w2, b2 = init_params(kp)
    x2d = x.reshape(x.shape[0], -1)

    # --- f32 path: exact match against plain-JAX reference.
    out_f32 = jax.block_until_ready(
        mlp_forward(x, w1, b1, w2, b2, compute_dtype=jnp.float32))
    ref_f32 = jnp.maximum(x2d @ w1 + b1, 0.0) @ w2 + b2
    assert out_f32.shape == (8, 10)
    assert jnp.allclose(out_f32, ref_f32, atol=1e-5, rtol=1e-5)

    # --- default bf16 path: compare against a reference that performs the
    # same bf16 casts, with f32 accumulation.
    out_bf16 = jax.block_until_ready(mlp_forward(x, w1, b1, w2, b2))
    xb = x2d.astype(jnp.bfloat16).astype(jnp.float32)
    w1b = w1.astype(jnp.bfloat16).astype(jnp.float32)
    w2b = w2.astype(jnp.bfloat16).astype(jnp.float32)
    hb = jnp.maximum(xb @ w1b + b1, 0.0)
    ref_bf16 = hb.astype(jnp.bfloat16).astype(jnp.float32) @ w2b + b2
    assert out_bf16.shape == (8, 10)
    assert jnp.allclose(out_bf16, ref_bf16, atol=2e-3, rtol=2e-3)

    print("KERNEL_OK")
</pallas_src>

<mosaic_0001>
module attributes {stable_mosaic.version = 11 : i64} {
  func.func @mlp_kernel(%arg0: i32, %arg1: memref<8x256xf32, #tpu.memory_space<vmem>>, %arg2: memref<256x128xf32, #tpu.memory_space<vmem>>, %arg3: memref<1x128xf32, #tpu.memory_space<vmem>>, %arg4: memref<128x128xf32, #tpu.memory_space<vmem>>, %arg5: memref<1x128xf32, #tpu.memory_space<vmem>>, %arg6: memref<8x10xf32, #tpu.memory_space<vmem>>) attributes {dimension_semantics = [#tpu.dimension_semantics<parallel>], iteration_bounds = array<i64: 1>, scalar_prefetch = 0 : i64, scratch_operands = 0 : i64, tpu.core_type = #tpu.core_type<tc>, window_params = [{transform_indices = @transform_0, window_bounds = array<i64: 8, 256>}, {pipeline_mode = #tpu.pipeline_mode<synchronous>, transform_indices = @transform_1, window_bounds = array<i64: 256, 128>}, {pipeline_mode = #tpu.pipeline_mode<synchronous>, transform_indices = @transform_2, window_bounds = array<i64: 1, 128>}, {pipeline_mode = #tpu.pipeline_mode<synchronous>, transform_indices = @transform_3, window_bounds = array<i64: 128, 128>}, {pipeline_mode = #tpu.pipeline_mode<synchronous>, transform_indices = @transform_4, window_bounds = array<i64: 1, 128>}, {transform_indices = @transform_5, window_bounds = array<i64: 8, 10>}]} {
    %c0 = arith.constant 0 : index
    %c0_0 = arith.constant 0 : index
    %0 = vector.load %arg1[%c0, %c0_0] : memref<8x256xf32, #tpu.memory_space<vmem>>, vector<8x256xf32>
    %c0_1 = arith.constant 0 : index
    %c0_2 = arith.constant 0 : index
    %1 = vector.load %arg2[%c0_1, %c0_2] : memref<256x128xf32, #tpu.memory_space<vmem>>, vector<256x128xf32>
    %cst = arith.constant dense<0.000000e+00> : vector<8x128xf32>
    %2 = tpu.matmul %0, %1, %cst {dimension_numbers = #tpu.dot_dimension_numbers<[1], [0], [0], [1], [0, 0, 1, 1], [], []>} : vector<8x256xf32>, vector<256x128xf32>, vector<8x128xf32> -> vector<8x128xf32>
    %c0_3 = arith.constant 0 : index
    %c0_4 = arith.constant 0 : index
    %3 = vector.load %arg3[%c0_3, %c0_4] : memref<1x128xf32, #tpu.memory_space<vmem>>, vector<1x128xf32>
    %4 = vector.broadcast %3 : vector<1x128xf32> to vector<8x128xf32>
    %5 = arith.addf %2, %4 : vector<8x128xf32>
    %cst_5 = arith.constant 0.000000e+00 : f32
    %6 = vector.broadcast %cst_5 : f32 to vector<8x128xf32>
    %7 = arith.maximumf %5, %6 : vector<8x128xf32>
    %c0_6 = arith.constant 0 : index
    %c0_7 = arith.constant 0 : index
    %8 = vector.load %arg4[%c0_6, %c0_7] : memref<128x128xf32, #tpu.memory_space<vmem>>, vector<128x128xf32>
    %cst_8 = arith.constant dense<0.000000e+00> : vector<8x128xf32>
    %9 = tpu.matmul %7, %8, %cst_8 {dimension_numbers = #tpu.dot_dimension_numbers<[1], [0], [0], [1], [0, 0, 1, 1], [], []>} : vector<8x128xf32>, vector<128x128xf32>, vector<8x128xf32> -> vector<8x128xf32>
    %c0_9 = arith.constant 0 : index
    %c0_10 = arith.constant 0 : index
    %10 = vector.load %arg5[%c0_9, %c0_10] : memref<1x128xf32, #tpu.memory_space<vmem>>, vector<1x128xf32>
    %11 = vector.broadcast %10 : vector<1x128xf32> to vector<8x128xf32>
    %12 = arith.addf %9, %11 : vector<8x128xf32>
    %13 = vector.extract_strided_slice %12 {offsets = [0, 0], sizes = [8, 10], strides = [1, 1]} : vector<8x128xf32> to vector<8x10xf32>
    %c0_11 = arith.constant 0 : index
    %c0_12 = arith.constant 0 : index
    %14 = vector.load %arg6[%c0_11, %c0_12] : memref<8x10xf32, #tpu.memory_space<vmem>>, vector<8x10xf32>
    tpu.vector_store %arg6[%c0_11, %c0_12], %13 {strides = array<i32>} : memref<8x10xf32, #tpu.memory_space<vmem>>, vector<8x10xf32>,
    return
  }
  func.func @transform_0(%arg0: i32) -> (i32, i32) {
    %c0_i32 = arith.constant 0 : i32
    %c0_i32_0 = arith.constant 0 : i32
    return %arg0, %c0_i32 : i32, i32
  }
  func.func @transform_1(%arg0: i32) -> (i32, i32) {
    %c0_i32 = arith.constant 0 : i32
    %c0_i32_0 = arith.constant 0 : i32
    %c0_i32_1 = arith.constant 0 : i32
    return %c0_i32, %c0_i32_0 : i32, i32
  }
  func.func @transform_2(%arg0: i32) -> (i32, i32) {
    %c0_i32 = arith.constant 0 : i32
    %c0_i32_0 = arith.constant 0 : i32
    %c0_i32_1 = arith.constant 0 : i32
    return %c0_i32, %c0_i32_0 : i32, i32
  }
  func.func @transform_3(%arg0: i32) -> (i32, i32) {
    %c0_i32 = arith.constant 0 : i32
    %c0_i32_0 = arith.constant 0 : i32
    %c0_i32_1 = arith.constant 0 : i32
    return %c0_i32, %c0_i32_0 : i32, i32
  }
  func.func @transform_4(%arg0: i32) -> (i32, i32) {
    %c0_i32 = arith.constant 0 : i32
    %c0_i32_0 = arith.constant 0 : i32
    %c0_i32_1 = arith.constant 0 : i32
    return %c0_i32, %c0_i32_0 : i32, i32
  }
  func.func @transform_5(%arg0: i32) -> (i32, i32) {
    %c0_i32 = arith.constant 0 : i32
    %c0_i32_0 = arith.constant 0 : i32
    return %arg0, %c0_i32 : i32, i32
  }
}

</mosaic_0001>

<bundles_post_ra>
// kernel: mlp_forward.1
= control target key start
LH: loop header
LB: loop body
LE: loop exit
PB: predicated region body
PF: predicated region fallthrough
CT: control target
= control target key end

     0   :  { %v356_v4 = vmov 0.0   ;;  %s565_s0 = inlined_call_operand.vmem [shape: f32[8,256], index: 0, kind: input, shape index: {}]   ;;  %s566_s1 = inlined_call_operand.vmem [shape: f32[256,128], index: 1, kind: input, shape index: {}]   ;;  %s567_s2 = inlined_call_operand.vmem [shape: f32[1,128], index: 2, kind: input, shape index: {}]   ;;  %s568_s3 = inlined_call_operand.vmem [shape: f32[128,128], index: 3, kind: input, shape index: {}]   ;;  %s569_s4 = inlined_call_operand.vmem [shape: f32[1,128], index: 4, kind: input, shape index: {}]   ;;  %s570_s5 = inlined_call_operand.hbm [shape: f32[8,10], index: 5, kind: output, shape index: {}]  }
   0x1   :  { %v54_v0 = vld [vmem:[%s566_s1 + $0xf8] sm:$0xff]  ;;  %v53_v2 = vld [vmem:[%s566_s1 + $0xf0] sm:$0xff]  ;;  %296 = vmatprep.subr.mxu1 %v356_v4  ;;  %v52_v5 = vld [vmem:[%s566_s1 + $0xe8] sm:$0xff] }
   0x2   :  { %v38_v1 = vld [vmem:[%s566_s1 + $0x78] sm:$0xff]  ;;  %244 = vmatprep.subr.mxu0 %v54_v0  ;;  %v37_v3 = vld [vmem:[%s566_s1 + $0x70] sm:$0xff]  ;;  %v36_v6 = vld [vmem:[%s566_s1 + $0x68] sm:$0xff] }
   0x3   :  { %245 = vmatpush3.msra.mxu0 %v38_v1  ;;  %v51_v7 = vld [vmem:[%s566_s1 + $0xe0] sm:$0xff]  ;;  %v50_v9 = vld [vmem:[%s566_s1 + $0xd8] sm:$0xff]  ;;  %v49_v11 = vld [vmem:[%s566_s1 + $0xd0] sm:$0xff] }
   0x4   :  { %246 = vmatprep.subr.mxu0 %v53_v2  ;;  %v35_v8 = vld [vmem:[%s566_s1 + $0x60] sm:$0xff]  ;;  %v34_v10 = vld [vmem:[%s566_s1 + $0x58] sm:$0xff]  ;;  %v33_v12 = vld [vmem:[%s566_s1 + $0x50] sm:$0xff] }
   0x5   :  { %247 = vmatpush3.msra.mxu0 %v37_v3  ;;  %v48_v13 = vld [vmem:[%s566_s1 + $0xc8] sm:$0xff]  ;;  %v148_v16 = vld [vmem:[%s568_s3 + $0x78] sm:$0xff]  ;;  %v147_v17 = vld [vmem:[%s568_s3 + $0x70] sm:$0xff] }
   0x6   :  { %248 = vmatprep.subr.mxu0 %v52_v5  ;;  %v22_v14 = vld [vmem:[%s565_s0 + $0x8] sm:$0xff]  ;;  %v47_v18 = vld [vmem:[%s566_s1 + $0xc0] sm:$0xff]  ;;  %297 = vmatpush3.msra.mxu1 %v148_v16  ;;  %v46_v21 = vld [vmem:[%s566_s1 + $0xb8] sm:$0xff] }
   0x7   :  { %249 = vmatpush3.msra.mxu0 %v36_v6  ;;  %v32_v15 = vld [vmem:[%s566_s1 + $0x48] sm:$0xff]  ;;  %126 = vmatprep.mubr.f32.mxu0 %v22_v14  ;;  %v31_v19 = vld [vmem:[%s566_s1 + $0x40] sm:$0xff]  ;;  %v30_v22 = vld [vmem:[%s566_s1 + $0x38] sm:$0xff] }
   0x8   :  { %250 = vmatprep.subr.mxu0 %v51_v7  ;;  %298 = vmatprep.subr.mxu1 %v356_v4  ;;  %v146_v20 = vld [vmem:[%s568_s3 + $0x68] sm:$0xff]  ;;  %v145_v23 = vld [vmem:[%s568_s3 + $0x60] sm:$0xff] }
   0x9   :  { %251 = vmatpush3.msra.mxu0 %v35_v8  ;;  %299 = vmatpush3.msra.mxu1 %v147_v17 }
   0xa   :  { %252 = vmatprep.subr.mxu0 %v50_v9  ;;  %300 = vmatprep.subr.mxu1 %v356_v4 }
   0xb   :  { %253 = vmatpush3.msra.mxu0 %v34_v10 }
   0xc   :  { %254 = vmatprep.subr.mxu0 %v49_v11 }
   0xd   :  { %255 = vmatpush3.msra.mxu0 %v33_v12 }
   0xe   :  { %256 = vmatprep.subr.mxu0 %v48_v13 }
   0xf   :  { %257 = vmatpush3.msra.mxu0 %v32_v15 }
  0x10   :  { %258 = vmatprep.subr.mxu0 %v47_v18 }
  0x11   :  { %10 = vsyncpa [#allocation3], 0  ;;  %259 = vmatpush3.msra.mxu0 %v31_v19  ;;  %v45_v24 = vld [vmem:[%s566_s1 + $0xb0] sm:$0xff]  ;;  %301 = vmatpush3.msra.mxu1 %v146_v20  ;;  %v144_v26 = vld [vmem:[%s568_s3 + $0x58] sm:$0xff]  ;;  %vm357_vm0 = vmmov 0   ;;  %s358_s20 = smov [#allocation2]  }
  0x12   :  { %260 = vmatprep.subr.mxu0 %v46_v21  ;;  %v29_v25 = vld [vmem:[%s566_s1 + $0x30] sm:$0xff]  ;;  %302 = vmatprep.subr.mxu1 %v356_v4  ;;  %v44_v27 = vld [vmem:[%s566_s1 + $0xa8] sm:$0xff]  ;;  %v43_v30 = vld [vmem:[%s566_s1 + $0xa0] sm:$0xff]  ;;  %vm226_vm1 = vcmask 80896  }
  0x13   :  { %261 = vmatpush3.msra.mxu0 %v30_v22  ;;  %303 = vmatpush3.msra.mxu1 %v145_v23  ;;  %v28_v28 = vld [vmem:[%s566_s1 + $0x28] sm:$0xff]  ;;  %v143_v29 = vld [vmem:[%s568_s3 + $0x50] sm:$0xff]  ;;  %v27_v31 = vld [vmem:[%s566_s1 + $0x20] sm:$0xff] }
  0x14   :  { %262 = vmatprep.subr.mxu0 %v45_v24  ;;  %304 = vmatprep.subr.mxu1 %v356_v4  ;;  %v142_v32 = vld [vmem:[%s568_s3 + $0x48] sm:$0xff]  ;;  %v42_v33 = vld [vmem:[%s566_s1 + $0x98] sm:$0xff]  ;;  %v141_v35 = vld [vmem:[%s568_s3 + $0x40] sm:$0xff] }
  0x15   :  { %263 = vmatpush3.msra.mxu0 %v29_v25  ;;  %305 = vmatpush3.msra.mxu1 %v144_v26  ;;  %v26_v34 = vld [vmem:[%s566_s1 + $0x18] sm:$0xff]  ;;  %v41_v36 = vld [vmem:[%s566_s1 + $0x90] sm:$0xff]  ;;  %v40_v39 = vld [vmem:[%s566_s1 + $0x88] sm:$0xff] }
  0x16   :  { %264 = vmatprep.subr.mxu0 %v44_v27  ;;  %306 = vmatprep.subr.mxu1 %v356_v4  ;;  %v25_v37 = vld [vmem:[%s566_s1 + $0x10] sm:$0xff]  ;;  %v140_v38 = vld [vmem:[%s568_s3 + $0x38] sm:$0xff]  ;;  %v24_v40 = vld [vmem:[%s566_s1 + $0x8] sm:$0xff] }
  0x17   :  { %265 = vmatpush3.msra.mxu0 %v28_v28  ;;  %307 = vmatpush3.msra.mxu1 %v143_v29  ;;  %v139_v41 = vld [vmem:[%s568_s3 + $0x30] sm:$0xff]  ;;  %v39_v42 = vld [vmem:[%s566_s1 + $0x80] sm:$0xff]  ;;  %v138_v44 = vld [vmem:[%s568_s3 + $0x28] sm:$0xff] }
  0x18   :  { %266 = vmatprep.subr.mxu0 %v43_v30  ;;  %308 = vmatprep.subr.mxu1 %v356_v4  ;;  %v23_v43 = vld [vmem:[%s566_s1] sm:$0xff]  ;;  %v136_v47 = vld [vmem:[%s568_s3 + $0x18] sm:$0xff]  ;;  %v135_v48 = vld [vmem:[%s568_s3 + $0x10] sm:$0xff] }
  0x19   :  { %267 = vmatpush3.msra.mxu0 %v27_v31  ;;  %309 = vmatpush3.msra.mxu1 %v142_v32  ;;  %v21_v45 = vld [vmem:[%s565_s0] sm:$0xff]  ;;  %v134_v49 = vld [vmem:[%s568_s3 + $0x8] sm:$0xff] }
  0x1a   :  { %268 = vmatprep.subr.mxu0 %v42_v33  ;;  %310 = vmatprep.subr.mxu1 %v356_v4  ;;  %v137_v46 = vld [vmem:[%s568_s3 + $0x20] sm:$0xff] }
  0x1b   :  { %269 = vmatpush3.msra.mxu0 %v26_v34  ;;  %311 = vmatpush3.msra.mxu1 %v141_v35  ;;  %v133_v50 = vld [vmem:[%s568_s3] sm:$0xff]  ;;  %s234_s3 = sshll.u32 %s358_s20, 4  ;;  %s235_s3 = int_to_ptr.vmem [resolvable:$true] %s234_s3 }
  0x1c   :  { %270 = vmatprep.subr.mxu0 %v41_v36  ;;  %312 = vmatprep.subr.mxu1 %v356_v4  ;;  %v242_v52 = vld [vmem:[%s567_s2] ss:$0 sm:$0xff]  ;;  %s334_s21 = scalar_lea.vmem %s235_s3, 128  ;;  %p339_p1 = scmp.lt.s32.totalorder %s235_s3, %s235_s3 }
  0x1d   :  { %271 = vmatpush3.msra.mxu0 %v25_v37  ;;  %313 = vmatpush3.msra.mxu1 %v140_v38  ;;  %v243_v57 = vld [vmem:[%s569_s4] ss:$0 sm:$0xff]  ;;  %p335_p0 = scmp.ne.s32.totalorder %s235_s3, %s334_s21  ;;  %p340_p2 = scmp.lt.s32.totalorder %s334_s21, %s334_s21 }
  0x1e   :  { %272 = vmatprep.subr.mxu0 %v40_v39  ;;  %314 = vmatprep.subr.mxu1 %v356_v4 }
  0x1f   :  { %273 = vmatpush3.msra.mxu0 %v24_v40  ;;  %315 = vmatpush3.msra.mxu1 %v139_v41  ;;  %p341_p3 = por %p340_p2, %p339_p1 }
  0x20   :  { %274 = vmatprep.subr.mxu0 %v39_v42  ;;  %316 = vmatprep.subr.mxu1 %v356_v4 }
  0x21   :  { %275 = vmatpush3.msra.mxu0 %v23_v43  ;;  %317 = vmatpush3.msra.mxu1 %v138_v44  ;;  %p342_p4 = pnand %p341_p3, %p335_p0 }
  0x22   :  { %127 = vmatmul.mubr.f32.vlgmr.msra.gmra.mxu0 %v21_v45  ;;  %318 = vmatprep.subr.mxu1 %v356_v4 }
  0x23   :  { %319 = vmatpush3.msra.mxu1 %v137_v46  ;;  %328 = vmatprep.mubr.msk.f32.mxu1 %vm357_vm0, %v356_v4 }
  0x24   :  { %320 = vmatprep.subr.mxu1 %v356_v4 }
  0x25   :  { %321 = vmatpush3.msra.mxu1 %v136_v47 }
  0x26   :  { %322 = vmatprep.subr.mxu1 %v356_v4 }
  0x27   :  { %323 = vmatpush3.msra.mxu1 %v135_v48 }
  0x28   :  { %324 = vmatprep.subr.mxu1 %v356_v4 }
  0x29   :  { %325 = vmatpush3.msra.mxu1 %v134_v49 }
  0x2a   :  { %326 = vmatprep.subr.mxu1 %v356_v4 }
  0x2b   :  { %327 = vmatpush3.msra.mxu1 %v133_v50 }
  0xe2   :  { %v276_v51 = vpop.f32.mrf.mxu0 }
  0xe4   :  { %v277_v53 = vpop.f32.mrf.mxu0 }
  0xe5   :  { %v278_v54 = vadd.f32 %v277_v53, %v276_v51 }
  0xe7   :  { %v129_v55 = vadd.f32 %v278_v54, %v242_v52 }
  0xe9   :  { %v132_v56 = vmax.f32 %v129_v55, 0.0 }
  0xeb   :  { %329 = vmatmul.mubr.f32.vlgmr.msra.gmra.mxu1 %v132_v56 }
 0x1ab   :  { %v222_v58 = vpop.f32.mrf.mxu1 }
 0x1ac   :  { %v223_v59 = vadd.f32 %v243_v57, %v222_v58 }
 0x1ad   :  { %v330_v60 = vpop.f32.mrf.mxu1 }
 0x1ae   :  { %227 = vst.msk [vmem:[#allocation2] sm:$0xff] %vm226_vm1, %v223_v59 }
 0x1af   :  { %345 = shalt.err (!%p342_p4)
}
 0x1b0   :  { %237 = dma.vmem_to_hbm [thread:$0]  %s235_s3, 128, %s570_s5, [#allocation3]  }
 0x1b1   :  { %354 = dma.done.wait [#allocation3], 128  }
 0x1b2   :  { %355 = vsyncadd [#allocation3], 4294967168 }
 0x1b3   :  { %241 = vsyncpa [#allocation3], 1 }

</bundles_post_ra>
